<compile_context>
chip_gen: v5e
topology: v5e:2x2
jax: 0.10.0
libtpu: 0.0.40
codegen_flags: <defaults>
</compile_context>

<pallas_src>
import functools

import jax
import jax.numpy as jnp
from jax.experimental import pallas as pl
from jax.experimental.pallas import tpu as pltpu


# ----------------------------- Pallas kernel --------------------------------


def _small_mm(w_t, x):
    """(M, K) @ (K, N) -> (M, N) f32.  VPU broadcast-MACs for tiny K, MXU else."""
    m, k = w_t.shape
    if k >= 16:
        return jnp.dot(w_t, x, preferred_element_type=jnp.float32)
    acc = jnp.zeros((m, x.shape[1]), jnp.float32)
    for kk in range(k):
        acc = acc + w_t[:, kk:kk + 1] * x[kk:kk + 1, :]
    return acc


def _fused_ir_kernel(*refs, stride, n_planes, has_expand, use_res, wo, chid):
    # refs = (x_plane_0..x_plane_{n_planes-1}, [w_exp, b_exp],
    #         w_dw, b_dw, w_red, b_red, out)
    xs = refs[:n_planes]
    idx = n_planes
    if has_expand:
        w_exp_ref, b_exp_ref = refs[idx], refs[idx + 1]
        idx += 2
    w_dw_ref, b_dw_ref, w_red_ref, b_red_ref, out_ref = refs[idx:idx + 5]

    hwo = xs[0].shape[2]       # flattened output-resolution spatial size
    pad = wo + 1               # flat zero-pad width on each side

    if has_expand:
        w_exp = w_exp_ref[...]     # (Chid, Cin), BN scale pre-folded
        b_exp = b_exp_ref[...]     # (Chid, 1)

    # ---- 1x1 expand + BN + SiLU (kept entirely in VMEM) --------------------
    planes = []
    for p in range(n_planes):
        xp = xs[p][0].astype(jnp.float32)          # (Cin, hwo)
        if has_expand:
            h = _small_mm(w_exp, xp) + b_exp
            h = h * jax.nn.sigmoid(h)              # SiLU
        else:
            h = xp
        zpad = jnp.zeros((chid, pad), jnp.float32)
        planes.append(jnp.concatenate([zpad, h, zpad], axis=1))

    # ---- 3x3 depthwise conv (stride folded in) + BN + SiLU ------------------
    w_dw = w_dw_ref[...]                            # (Chid, 9), scale folded
    # Column-border masks hoisted out of the 9-tap loop (one compute each).
    col = jax.lax.broadcasted_iota(jnp.int32, (1, hwo), 1) % wo
    mask_m1 = col >= 1                              # source col = oj - 1 valid
    mask_p1 = col < (wo - 1)                        # source col = oj + 1 valid

    acc = jnp.zeros((chid, hwo), jnp.float32)
    for di in range(3):
        for dj in range(3):
            if stride == 1:
                pidx, dri, drj = 0, di - 1, dj - 1
            else:  # stride == 2: parity-plane (space-to-depth) decomposition
                pidx = ((di + 1) % 2) * 2 + ((dj + 1) % 2)
                dri = -1 if di == 0 else 0
                drj = -1 if dj == 0 else 0
            start = pad + dri * wo + drj            # static lane-offset slice
            src = planes[pidx][:, start:start + hwo]
            if drj == -1:   # mask column wrap-around at the image borders
                src = jnp.where(mask_m1, src, 0.0)
            elif drj == 1:
                src = jnp.where(mask_p1, src, 0.0)
            tap = di * 3 + dj
            acc = acc + src * w_dw[:, tap:tap + 1]
    y = acc + b_dw_ref[...]
    y = y * jax.nn.sigmoid(y)                       # SiLU

    # ---- 1x1 reduce + BN (no act) [+ residual] ------------------------------
    out = _small_mm(w_red_ref[...], y) + b_red_ref[...]
    if use_res:
        out = out + xs[0][0].astype(jnp.float32)    # stride==1 -> single plane
    out_ref[0] = out.astype(out_ref.dtype)


# ------------------------------- wrapper -------------------------------------


def inverted_residual_forward(x_nchw, params, stride, expand_ratio):
    N, Cin, H, W = x_nchw.shape
    assert stride in (1, 2)
    has_expand = expand_ratio != 1
    Chid = params["w_exp"].shape[1] if has_expand else Cin
    Cout = params["w_red"].shape[1]
    use_res = (stride == 1) and (Cin == Cout)
    Ho = (H - 1) // stride + 1
    Wo = (W - 1) // stride + 1
    HWo = Ho * Wo

    # Channel-major, flattened-spatial (lane-dense) inputs.
    if stride == 1:
        planes = [x_nchw.reshape(N, Cin, H * W)]
    else:
        assert H % 2 == 0 and W % 2 == 0, "stride-2 path assumes even H, W"
        planes = [x_nchw[:, :, a::2, b::2].reshape(N, Cin, HWo)
                  for a in (0, 1) for b in (0, 1)]
    n_planes = len(planes)

    args = list(planes)
    in_specs = [pl.BlockSpec((1, Cin, HWo), lambda n: (n, 0, 0))
                for _ in range(n_planes)]

    def _full2d(a):
        return pl.BlockSpec(tuple(a.shape), lambda n: (0, 0))

    # Fold BN scale into the conv weights; kernel only adds the folded bias.
    if has_expand:
        w_exp_t = (params["w_exp"] * params["s_exp"][None, :]).T  # (Chid, Cin)
        b_exp = params["b_exp"].reshape(Chid, 1)
        args += [w_exp_t, b_exp]
        in_specs += [_full2d(w_exp_t), _full2d(b_exp)]

    w_dw = (params["w_dw"] * params["s_dw"][None, None, :]).reshape(9, Chid).T
    b_dw = params["b_dw"].reshape(Chid, 1)
    w_red_t = (params["w_red"] * params["s_red"][None, :]).T      # (Cout, Chid)
    b_red = params["b_red"].reshape(Cout, 1)
    args += [w_dw, b_dw, w_red_t, b_red]
    in_specs += [_full2d(w_dw), _full2d(b_dw), _full2d(w_red_t), _full2d(b_red)]

    kernel = functools.partial(
        _fused_ir_kernel, stride=stride, n_planes=n_planes,
        has_expand=has_expand, use_res=use_res, wo=Wo, chid=Chid)

    out = pl.pallas_call(
        kernel,
        out_shape=jax.ShapeDtypeStruct((N, Cout, HWo), x_nchw.dtype),
        grid=(N,),
        in_specs=in_specs,
        out_specs=pl.BlockSpec((1, Cout, HWo), lambda n: (n, 0, 0)),
        compiler_params=pltpu.CompilerParams(dimension_semantics=("parallel",)),
    )(*args)
    return out.reshape(N, Cout, Ho, Wo)


# ------------------------- params / reference --------------------------------


def make_params(key, inp, oup, expand_ratio):
    hidden = int(round(inp * expand_ratio))
    keys = jax.random.split(key, 15)
    eps = 1e-5

    def fold_bn(kg, kb, km, kv, c):
        gamma = 1.0 + 0.1 * jax.random.normal(kg, (c,), jnp.float32)
        beta = 0.1 * jax.random.normal(kb, (c,), jnp.float32)
        mean = 0.05 * jax.random.normal(km, (c,), jnp.float32)
        var = 1.0 + 0.1 * jax.random.uniform(kv, (c,), jnp.float32)
        s = gamma / jnp.sqrt(var + eps)
        b = beta - mean * s
        return s, b

    p = {}
    # exp_1x1: PyTorch Conv2d weight (hidden, inp, 1, 1) -> (inp, hidden)
    p["w_exp"] = 0.3 * jax.random.normal(keys[0], (inp, hidden), jnp.float32)
    p["s_exp"], p["b_exp"] = fold_bn(keys[1], keys[2], keys[3], keys[4], hidden)
    # conv_3x3 depthwise: (hidden, 1, 3, 3) -> (3, 3, hidden)
    p["w_dw"] = 0.3 * jax.random.normal(keys[5], (3, 3, hidden), jnp.float32)
    p["s_dw"], p["b_dw"] = fold_bn(keys[6], keys[7], keys[8], keys[9], hidden)
    # red_1x1: (oup, hidden, 1, 1) -> (hidden, oup)
    p["w_red"] = 0.3 * jax.random.normal(keys[10], (hidden, oup), jnp.float32)
    p["s_red"], p["b_red"] = fold_bn(keys[11], keys[12], keys[13], keys[14], oup)
    return p


def ref_forward(x_nchw, params, stride, expand_ratio):
    dn = ("NHWC", "HWIO", "NHWC")
    x = jnp.transpose(x_nchw, (0, 2, 3, 1))
    h = x
    if expand_ratio != 1:
        Cin, Chid = params["w_exp"].shape
        h = jax.lax.conv_general_dilated(
            h, params["w_exp"].reshape(1, 1, Cin, Chid), (1, 1), "VALID",
            dimension_numbers=dn)
        h = h * params["s_exp"] + params["b_exp"]
        h = h * jax.nn.sigmoid(h)
    Chid = h.shape[-1]
    h = jax.lax.conv_general_dilated(
        h, params["w_dw"].reshape(3, 3, 1, Chid), (stride, stride),
        ((1, 1), (1, 1)), dimension_numbers=dn, feature_group_count=Chid)
    h = h * params["s_dw"] + params["b_dw"]
    h = h * jax.nn.sigmoid(h)
    Cout = params["w_red"].shape[1]
    h = jax.lax.conv_general_dilated(
        h, params["w_red"].reshape(1, 1, Chid, Cout), (1, 1), "VALID",
        dimension_numbers=dn)
    h = h * params["s_red"] + params["b_red"]
    if stride == 1 and x.shape[-1] == Cout:
        h = h + x
    return jnp.transpose(h, (0, 3, 1, 2))


# --------------------------------- main ---------------------------------------


if __name__ == "__main__":
    root = jax.random.PRNGKey(0)
    configs = [
        # (N, Cin, H, W, Cout, stride, expand_ratio)
        (2, 4, 16, 16, 4, 1, 2),   # residual path (InvertedResidual(4,4,1,2))
        (2, 4, 16, 16, 8, 2, 2),   # stride-2 path, striding done in-kernel
    ]
    for i, (N, Cin, H, W, Cout, stride, er) in enumerate(configs):
        kx, kp = jax.random.split(jax.random.fold_in(root, i))
        x = jax.random.normal(kx, (N, Cin, H, W), jnp.float32)
        params = make_params(kp, Cin, Cout, er)

        out = jax.block_until_ready(
            inverted_residual_forward(x, params, stride, er))
        ref = jax.block_until_ready(ref_forward(x, params, stride, er))

        assert out.shape == ref.shape, (out.shape, ref.shape)
        err = float(jnp.max(jnp.abs(out - ref)))
        assert jnp.allclose(out, ref, rtol=1e-4, atol=1e-4), err

    print("KERNEL_OK")
</pallas_src>

<mosaic_0001>
module attributes {stable_mosaic.version = 11 : i64} {
  func.func @_fused_ir_kernel(%arg0: i32, %arg1: memref<1x4x256xf32, #tpu.memory_space<vmem>>, %arg2: memref<8x4xf32, #tpu.memory_space<vmem>>, %arg3: memref<8x1xf32, #tpu.memory_space<vmem>>, %arg4: memref<8x9xf32, #tpu.memory_space<vmem>>, %arg5: memref<8x1xf32, #tpu.memory_space<vmem>>, %arg6: memref<4x8xf32, #tpu.memory_space<vmem>>, %arg7: memref<4x1xf32, #tpu.memory_space<vmem>>, %arg8: memref<1x4x256xf32, #tpu.memory_space<vmem>>) attributes {dimension_semantics = [#tpu.dimension_semantics<parallel>], iteration_bounds = array<i64: 2>, scalar_prefetch = 0 : i64, scratch_operands = 0 : i64, tpu.core_type = #tpu.core_type<tc>, window_params = [{transform_indices = @transform_0, window_bounds = array<i64: 1, 4, 256>}, {pipeline_mode = #tpu.pipeline_mode<synchronous>, transform_indices = @transform_1, window_bounds = array<i64: 8, 4>}, {pipeline_mode = #tpu.pipeline_mode<synchronous>, transform_indices = @transform_2, window_bounds = array<i64: 8, 1>}, {pipeline_mode = #tpu.pipeline_mode<synchronous>, transform_indices = @transform_3, window_bounds = array<i64: 8, 9>}, {pipeline_mode = #tpu.pipeline_mode<synchronous>, transform_indices = @transform_4, window_bounds = array<i64: 8, 1>}, {pipeline_mode = #tpu.pipeline_mode<synchronous>, transform_indices = @transform_5, window_bounds = array<i64: 4, 8>}, {pipeline_mode = #tpu.pipeline_mode<synchronous>, transform_indices = @transform_6, window_bounds = array<i64: 4, 1>}, {transform_indices = @transform_7, window_bounds = array<i64: 1, 4, 256>}]} {
    %c0 = arith.constant 0 : index
    %c0_0 = arith.constant 0 : index
    %0 = vector.load %arg2[%c0, %c0_0] : memref<8x4xf32, #tpu.memory_space<vmem>>, vector<8x4xf32>
    %c0_1 = arith.constant 0 : index
    %c0_2 = arith.constant 0 : index
    %1 = vector.load %arg3[%c0_1, %c0_2] : memref<8x1xf32, #tpu.memory_space<vmem>>, vector<8x1xf32>
    %c0_3 = arith.constant 0 : index
    %c0_4 = arith.constant 0 : index
    %c0_5 = arith.constant 0 : index
    %2 = vector.load %arg1[%c0_3, %c0_4, %c0_5] : memref<1x4x256xf32, #tpu.memory_space<vmem>>, vector<1x4x256xf32>
    %3 = vector.shape_cast %2 : vector<1x4x256xf32> to vector<4x256xf32>
    %cst = arith.constant 0.000000e+00 : f32
    %4 = vector.broadcast %cst : f32 to vector<8x256xf32>
    %5 = vector.extract_strided_slice %0 {offsets = [0, 0], sizes = [8, 1], strides = [1, 1]} : vector<8x4xf32> to vector<8x1xf32>
    %6 = vector.extract_strided_slice %3 {offsets = [0, 0], sizes = [1, 256], strides = [1, 1]} : vector<4x256xf32> to vector<1x256xf32>
    %7 = vector.broadcast %5 : vector<8x1xf32> to vector<8x256xf32>
    %8 = vector.broadcast %6 : vector<1x256xf32> to vector<8x256xf32>
    %9 = arith.mulf %7, %8 : vector<8x256xf32>
    %10 = arith.addf %4, %9 : vector<8x256xf32>
    %11 = vector.extract_strided_slice %0 {offsets = [0, 1], sizes = [8, 1], strides = [1, 1]} : vector<8x4xf32> to vector<8x1xf32>
    %12 = vector.extract_strided_slice %3 {offsets = [1, 0], sizes = [1, 256], strides = [1, 1]} : vector<4x256xf32> to vector<1x256xf32>
    %13 = vector.broadcast %11 : vector<8x1xf32> to vector<8x256xf32>
    %14 = vector.broadcast %12 : vector<1x256xf32> to vector<8x256xf32>
    %15 = arith.mulf %13, %14 : vector<8x256xf32>
    %16 = arith.addf %10, %15 : vector<8x256xf32>
    %17 = vector.extract_strided_slice %0 {offsets = [0, 2], sizes = [8, 1], strides = [1, 1]} : vector<8x4xf32> to vector<8x1xf32>
    %18 = vector.extract_strided_slice %3 {offsets = [2, 0], sizes = [1, 256], strides = [1, 1]} : vector<4x256xf32> to vector<1x256xf32>
    %19 = vector.broadcast %17 : vector<8x1xf32> to vector<8x256xf32>
    %20 = vector.broadcast %18 : vector<1x256xf32> to vector<8x256xf32>
    %21 = arith.mulf %19, %20 : vector<8x256xf32>
    %22 = arith.addf %16, %21 : vector<8x256xf32>
    %23 = vector.extract_strided_slice %0 {offsets = [0, 3], sizes = [8, 1], strides = [1, 1]} : vector<8x4xf32> to vector<8x1xf32>
    %24 = vector.extract_strided_slice %3 {offsets = [3, 0], sizes = [1, 256], strides = [1, 1]} : vector<4x256xf32> to vector<1x256xf32>
    %25 = vector.broadcast %23 : vector<8x1xf32> to vector<8x256xf32>
    %26 = vector.broadcast %24 : vector<1x256xf32> to vector<8x256xf32>
    %27 = arith.mulf %25, %26 : vector<8x256xf32>
    %28 = arith.addf %22, %27 : vector<8x256xf32>
    %29 = vector.broadcast %1 : vector<8x1xf32> to vector<8x256xf32>
    %30 = arith.addf %28, %29 : vector<8x256xf32>
    %31 = arith.negf %30 : vector<8x256xf32>
    %32 = math.exp %31 : vector<8x256xf32>
    %cst_6 = arith.constant 1.000000e+00 : f32
    %33 = vector.broadcast %cst_6 : f32 to vector<8x256xf32>
    %34 = arith.addf %33, %32 : vector<8x256xf32>
    %35 = arith.divf %33, %34 : vector<8x256xf32>
    %36 = arith.mulf %30, %35 : vector<8x256xf32>
    %cst_7 = arith.constant 0.000000e+00 : f32
    %37 = vector.broadcast %cst_7 : f32 to vector<8x17xf32>
    %38 = tpu.concatenate %37, %36, %37 in 1 : vector<8x17xf32>, vector<8x256xf32>, vector<8x17xf32> -> vector<8x290xf32>
    %c0_8 = arith.constant 0 : index
    %c0_9 = arith.constant 0 : index
    %39 = vector.load %arg4[%c0_8, %c0_9] : memref<8x9xf32, #tpu.memory_space<vmem>>, vector<8x9xf32>
    %40 = tpu.iota {dimensions = array<i32: 1>} : vector<1x256xi32>
    %c16_i32 = arith.constant 16 : i32
    %c0_i32 = arith.constant 0 : i32
    %41 = arith.cmpi eq, %c16_i32, %c0_i32 : i32
    %c1_i32 = arith.constant 1 : i32
    %42 = arith.select %41, %c1_i32, %c16_i32 : i32
    %43 = vector.broadcast %42 : i32 to vector<1x256xi32>
    %44 = arith.remsi %40, %43 : vector<1x256xi32>
    %c0_i32_10 = arith.constant 0 : i32
    %45 = vector.broadcast %c0_i32_10 : i32 to vector<1x256xi32>
    %46 = arith.cmpi ne, %44, %45 : vector<1x256xi32>
    %c0_i32_11 = arith.constant 0 : i32
    %47 = vector.broadcast %c0_i32_11 : i32 to vector<1x256xi32>
    %48 = arith.cmpi slt, %44, %47 : vector<1x256xi32>
    %c0_i32_12 = arith.constant 0 : i32
    %49 = arith.cmpi slt, %42, %c0_i32_12 : i32
    %50 = vector.broadcast %49 : i1 to vector<1x256xi1>
    %51 = vector.broadcast %50 : vector<1x256xi1> to vector<1x256xi1>
    %52 = arith.xori %48, %51 : vector<1x256xi1>
    %53 = arith.andi %52, %46 : vector<1x256xi1>
    %54 = vector.broadcast %42 : i32 to vector<1x256xi32>
    %55 = arith.addi %44, %54 : vector<1x256xi32>
    %56 = arith.select %53, %55, %44 : vector<1x256xi1>, vector<1x256xi32>
    %c1_i32_13 = arith.constant 1 : i32
    %57 = vector.broadcast %c1_i32_13 : i32 to vector<1x256xi32>
    %58 = arith.cmpi sge, %56, %57 : vector<1x256xi32>
    %c15_i32 = arith.constant 15 : i32
    %59 = vector.broadcast %c15_i32 : i32 to vector<1x256xi32>
    %60 = arith.cmpi slt, %56, %59 : vector<1x256xi32>
    %cst_14 = arith.constant 0.000000e+00 : f32
    %61 = vector.broadcast %cst_14 : f32 to vector<8x256xf32>
    %62 = vector.extract_strided_slice %38 {offsets = [0, 0], sizes = [8, 256], strides = [1, 1]} : vector<8x290xf32> to vector<8x256xf32>
    %cst_15 = arith.constant 0.000000e+00 : f32
    %63 = vector.shape_cast %58 : vector<1x256xi1> to vector<1x256xi1>
    %64 = vector.broadcast %63 : vector<1x256xi1> to vector<8x256xi1>
    %65 = vector.broadcast %cst_15 : f32 to vector<8x256xf32>
    %66 = arith.select %64, %62, %65 : vector<8x256xi1>, vector<8x256xf32>
    %67 = vector.extract_strided_slice %39 {offsets = [0, 0], sizes = [8, 1], strides = [1, 1]} : vector<8x9xf32> to vector<8x1xf32>
    %68 = vector.broadcast %67 : vector<8x1xf32> to vector<8x256xf32>
    %69 = arith.mulf %66, %68 : vector<8x256xf32>
    %70 = arith.addf %61, %69 : vector<8x256xf32>
    %71 = vector.extract_strided_slice %38 {offsets = [0, 1], sizes = [8, 256], strides = [1, 1]} : vector<8x290xf32> to vector<8x256xf32>
    %72 = vector.extract_strided_slice %39 {offsets = [0, 1], sizes = [8, 1], strides = [1, 1]} : vector<8x9xf32> to vector<8x1xf32>
    %73 = vector.broadcast %72 : vector<8x1xf32> to vector<8x256xf32>
    %74 = arith.mulf %71, %73 : vector<8x256xf32>
    %75 = arith.addf %70, %74 : vector<8x256xf32>
    %76 = vector.extract_strided_slice %38 {offsets = [0, 2], sizes = [8, 256], strides = [1, 1]} : vector<8x290xf32> to vector<8x256xf32>
    %cst_16 = arith.constant 0.000000e+00 : f32
    %77 = vector.shape_cast %60 : vector<1x256xi1> to vector<1x256xi1>
    %78 = vector.broadcast %77 : vector<1x256xi1> to vector<8x256xi1>
    %79 = vector.broadcast %cst_16 : f32 to vector<8x256xf32>
    %80 = arith.select %78, %76, %79 : vector<8x256xi1>, vector<8x256xf32>
    %81 = vector.extract_strided_slice %39 {offsets = [0, 2], sizes = [8, 1], strides = [1, 1]} : vector<8x9xf32> to vector<8x1xf32>
    %82 = vector.broadcast %81 : vector<8x1xf32> to vector<8x256xf32>
    %83 = arith.mulf %80, %82 : vector<8x256xf32>
    %84 = arith.addf %75, %83 : vector<8x256xf32>
    %85 = vector.extract_strided_slice %38 {offsets = [0, 16], sizes = [8, 256], strides = [1, 1]} : vector<8x290xf32> to vector<8x256xf32>
    %cst_17 = arith.constant 0.000000e+00 : f32
    %86 = vector.shape_cast %58 : vector<1x256xi1> to vector<1x256xi1>
    %87 = vector.broadcast %86 : vector<1x256xi1> to vector<8x256xi1>
    %88 = vector.broadcast %cst_17 : f32 to vector<8x256xf32>
    %89 = arith.select %87, %85, %88 : vector<8x256xi1>, vector<8x256xf32>
    %90 = vector.extract_strided_slice %39 {offsets = [0, 3], sizes = [8, 1], strides = [1, 1]} : vector<8x9xf32> to vector<8x1xf32>
    %91 = vector.broadcast %90 : vector<8x1xf32> to vector<8x256xf32>
    %92 = arith.mulf %89, %91 : vector<8x256xf32>
    %93 = arith.addf %84, %92 : vector<8x256xf32>
    %94 = vector.extract_strided_slice %38 {offsets = [0, 17], sizes = [8, 256], strides = [1, 1]} : vector<8x290xf32> to vector<8x256xf32>
    %95 = vector.extract_strided_slice %39 {offsets = [0, 4], sizes = [8, 1], strides = [1, 1]} : vector<8x9xf32> to vector<8x1xf32>
    %96 = vector.broadcast %95 : vector<8x1xf32> to vector<8x256xf32>
    %97 = arith.mulf %94, %96 : vector<8x256xf32>
    %98 = arith.addf %93, %97 : vector<8x256xf32>
    %99 = vector.extract_strided_slice %38 {offsets = [0, 18], sizes = [8, 256], strides = [1, 1]} : vector<8x290xf32> to vector<8x256xf32>
    %cst_18 = arith.constant 0.000000e+00 : f32
    %100 = vector.shape_cast %60 : vector<1x256xi1> to vector<1x256xi1>
    %101 = vector.broadcast %100 : vector<1x256xi1> to vector<8x256xi1>
    %102 = vector.broadcast %cst_18 : f32 to vector<8x256xf32>
    %103 = arith.select %101, %99, %102 : vector<8x256xi1>, vector<8x256xf32>
    %104 = vector.extract_strided_slice %39 {offsets = [0, 5], sizes = [8, 1], strides = [1, 1]} : vector<8x9xf32> to vector<8x1xf32>
    %105 = vector.broadcast %104 : vector<8x1xf32> to vector<8x256xf32>
    %106 = arith.mulf %103, %105 : vector<8x256xf32>
    %107 = arith.addf %98, %106 : vector<8x256xf32>
    %108 = vector.extract_strided_slice %38 {offsets = [0, 32], sizes = [8, 256], strides = [1, 1]} : vector<8x290xf32> to vector<8x256xf32>
    %cst_19 = arith.constant 0.000000e+00 : f32
    %109 = vector.shape_cast %58 : vector<1x256xi1> to vector<1x256xi1>
    %110 = vector.broadcast %109 : vector<1x256xi1> to vector<8x256xi1>
    %111 = vector.broadcast %cst_19 : f32 to vector<8x256xf32>
    %112 = arith.select %110, %108, %111 : vector<8x256xi1>, vector<8x256xf32>
    %113 = vector.extract_strided_slice %39 {offsets = [0, 6], sizes = [8, 1], strides = [1, 1]} : vector<8x9xf32> to vector<8x1xf32>
    %114 = vector.broadcast %113 : vector<8x1xf32> to vector<8x256xf32>
    %115 = arith.mulf %112, %114 : vector<8x256xf32>
    %116 = arith.addf %107, %115 : vector<8x256xf32>
    %117 = vector.extract_strided_slice %38 {offsets = [0, 33], sizes = [8, 256], strides = [1, 1]} : vector<8x290xf32> to vector<8x256xf32>
    %118 = vector.extract_strided_slice %39 {offsets = [0, 7], sizes = [8, 1], strides = [1, 1]} : vector<8x9xf32> to vector<8x1xf32>
    %119 = vector.broadcast %118 : vector<8x1xf32> to vector<8x256xf32>
    %120 = arith.mulf %117, %119 : vector<8x256xf32>
    %121 = arith.addf %116, %120 : vector<8x256xf32>
    %122 = vector.extract_strided_slice %38 {offsets = [0, 34], sizes = [8, 256], strides = [1, 1]} : vector<8x290xf32> to vector<8x256xf32>
    %cst_20 = arith.constant 0.000000e+00 : f32
    %123 = vector.shape_cast %60 : vector<1x256xi1> to vector<1x256xi1>
    %124 = vector.broadcast %123 : vector<1x256xi1> to vector<8x256xi1>
    %125 = vector.broadcast %cst_20 : f32 to vector<8x256xf32>
    %126 = arith.select %124, %122, %125 : vector<8x256xi1>, vector<8x256xf32>
    %127 = vector.extract_strided_slice %39 {offsets = [0, 8], sizes = [8, 1], strides = [1, 1]} : vector<8x9xf32> to vector<8x1xf32>
    %128 = vector.broadcast %127 : vector<8x1xf32> to vector<8x256xf32>
    %129 = arith.mulf %126, %128 : vector<8x256xf32>
    %130 = arith.addf %121, %129 : vector<8x256xf32>
    %c0_21 = arith.constant 0 : index
    %c0_22 = arith.constant 0 : index
    %131 = vector.load %arg5[%c0_21, %c0_22] : memref<8x1xf32, #tpu.memory_space<vmem>>, vector<8x1xf32>
    %132 = vector.broadcast %131 : vector<8x1xf32> to vector<8x256xf32>
    %133 = arith.addf %130, %132 : vector<8x256xf32>
    %134 = arith.negf %133 : vector<8x256xf32>
    %135 = math.exp %134 : vector<8x256xf32>
    %cst_23 = arith.constant 1.000000e+00 : f32
    %136 = vector.broadcast %cst_23 : f32 to vector<8x256xf32>
    %137 = arith.addf %136, %135 : vector<8x256xf32>
    %138 = arith.divf %136, %137 : vector<8x256xf32>
    %139 = arith.mulf %133, %138 : vector<8x256xf32>
    %c0_24 = arith.constant 0 : index
    %c0_25 = arith.constant 0 : index
    %140 = vector.load %arg6[%c0_24, %c0_25] : memref<4x8xf32, #tpu.memory_space<vmem>>, vector<4x8xf32>
    %cst_26 = arith.constant 0.000000e+00 : f32
    %141 = vector.broadcast %cst_26 : f32 to vector<4x256xf32>
    %142 = vector.extract_strided_slice %140 {offsets = [0, 0], sizes = [4, 1], strides = [1, 1]} : vector<4x8xf32> to vector<4x1xf32>
    %143 = vector.extract_strided_slice %139 {offsets = [0, 0], sizes = [1, 256], strides = [1, 1]} : vector<8x256xf32> to vector<1x256xf32>
    %144 = vector.broadcast %142 : vector<4x1xf32> to vector<4x256xf32>
    %145 = vector.broadcast %143 : vector<1x256xf32> to vector<4x256xf32>
    %146 = arith.mulf %144, %145 : vector<4x256xf32>
    %147 = arith.addf %141, %146 : vector<4x256xf32>
    %148 = vector.extract_strided_slice %140 {offsets = [0, 1], sizes = [4, 1], strides = [1, 1]} : vector<4x8xf32> to vector<4x1xf32>
    %149 = vector.extract_strided_slice %139 {offsets = [1, 0], sizes = [1, 256], strides = [1, 1]} : vector<8x256xf32> to vector<1x256xf32>
    %150 = vector.broadcast %148 : vector<4x1xf32> to vector<4x256xf32>
    %151 = vector.broadcast %149 : vector<1x256xf32> to vector<4x256xf32>
    %152 = arith.mulf %150, %151 : vector<4x256xf32>
    %153 = arith.addf %147, %152 : vector<4x256xf32>
    %154 = vector.extract_strided_slice %140 {offsets = [0, 2], sizes = [4, 1], strides = [1, 1]} : vector<4x8xf32> to vector<4x1xf32>
    %155 = vector.extract_strided_slice %139 {offsets = [2, 0], sizes = [1, 256], strides = [1, 1]} : vector<8x256xf32> to vector<1x256xf32>
    %156 = vector.broadcast %154 : vector<4x1xf32> to vector<4x256xf32>
    %157 = vector.broadcast %155 : vector<1x256xf32> to vector<4x256xf32>
    %158 = arith.mulf %156, %157 : vector<4x256xf32>
    %159 = arith.addf %153, %158 : vector<4x256xf32>
    %160 = vector.extract_strided_slice %140 {offsets = [0, 3], sizes = [4, 1], strides = [1, 1]} : vector<4x8xf32> to vector<4x1xf32>
    %161 = vector.extract_strided_slice %139 {offsets = [3, 0], sizes = [1, 256], strides = [1, 1]} : vector<8x256xf32> to vector<1x256xf32>
    %162 = vector.broadcast %160 : vector<4x1xf32> to vector<4x256xf32>
    %163 = vector.broadcast %161 : vector<1x256xf32> to vector<4x256xf32>
    %164 = arith.mulf %162, %163 : vector<4x256xf32>
    %165 = arith.addf %159, %164 : vector<4x256xf32>
    %166 = vector.extract_strided_slice %140 {offsets = [0, 4], sizes = [4, 1], strides = [1, 1]} : vector<4x8xf32> to vector<4x1xf32>
    %167 = vector.extract_strided_slice %139 {offsets = [4, 0], sizes = [1, 256], strides = [1, 1]} : vector<8x256xf32> to vector<1x256xf32>
    %168 = vector.broadcast %166 : vector<4x1xf32> to vector<4x256xf32>
    %169 = vector.broadcast %167 : vector<1x256xf32> to vector<4x256xf32>
    %170 = arith.mulf %168, %169 : vector<4x256xf32>
    %171 = arith.addf %165, %170 : vector<4x256xf32>
    %172 = vector.extract_strided_slice %140 {offsets = [0, 5], sizes = [4, 1], strides = [1, 1]} : vector<4x8xf32> to vector<4x1xf32>
    %173 = vector.extract_strided_slice %139 {offsets = [5, 0], sizes = [1, 256], strides = [1, 1]} : vector<8x256xf32> to vector<1x256xf32>
    %174 = vector.broadcast %172 : vector<4x1xf32> to vector<4x256xf32>
    %175 = vector.broadcast %173 : vector<1x256xf32> to vector<4x256xf32>
    %176 = arith.mulf %174, %175 : vector<4x256xf32>
    %177 = arith.addf %171, %176 : vector<4x256xf32>
    %178 = vector.extract_strided_slice %140 {offsets = [0, 6], sizes = [4, 1], strides = [1, 1]} : vector<4x8xf32> to vector<4x1xf32>
    %179 = vector.extract_strided_slice %139 {offsets = [6, 0], sizes = [1, 256], strides = [1, 1]} : vector<8x256xf32> to vector<1x256xf32>
    %180 = vector.broadcast %178 : vector<4x1xf32> to vector<4x256xf32>
    %181 = vector.broadcast %179 : vector<1x256xf32> to vector<4x256xf32>
    %182 = arith.mulf %180, %181 : vector<4x256xf32>
    %183 = arith.addf %177, %182 : vector<4x256xf32>
    %184 = vector.extract_strided_slice %140 {offsets = [0, 7], sizes = [4, 1], strides = [1, 1]} : vector<4x8xf32> to vector<4x1xf32>
    %185 = vector.extract_strided_slice %139 {offsets = [7, 0], sizes = [1, 256], strides = [1, 1]} : vector<8x256xf32> to vector<1x256xf32>
    %186 = vector.broadcast %184 : vector<4x1xf32> to vector<4x256xf32>
    %187 = vector.broadcast %185 : vector<1x256xf32> to vector<4x256xf32>
    %188 = arith.mulf %186, %187 : vector<4x256xf32>
    %189 = arith.addf %183, %188 : vector<4x256xf32>
    %c0_27 = arith.constant 0 : index
    %c0_28 = arith.constant 0 : index
    %190 = vector.load %arg7[%c0_27, %c0_28] : memref<4x1xf32, #tpu.memory_space<vmem>>, vector<4x1xf32>
    %191 = vector.broadcast %190 : vector<4x1xf32> to vector<4x256xf32>
    %192 = arith.addf %189, %191 : vector<4x256xf32>
    %c0_29 = arith.constant 0 : index
    %c0_30 = arith.constant 0 : index
    %c0_31 = arith.constant 0 : index
    %193 = vector.load %arg1[%c0_29, %c0_30, %c0_31] : memref<1x4x256xf32, #tpu.memory_space<vmem>>, vector<1x4x256xf32>
    %194 = vector.shape_cast %193 : vector<1x4x256xf32> to vector<4x256xf32>
    %195 = arith.addf %192, %194 : vector<4x256xf32>
    %c0_32 = arith.constant 0 : index
    %c0_33 = arith.constant 0 : index
    %c0_34 = arith.constant 0 : index
    %196 = vector.load %arg8[%c0_32, %c0_33, %c0_34] : memref<1x4x256xf32, #tpu.memory_space<vmem>>, vector<1x4x256xf32>
    %197 = vector.shape_cast %196 : vector<1x4x256xf32> to vector<4x256xf32>
    %198 = vector.shape_cast %195 : vector<4x256xf32> to vector<1x4x256xf32>
    tpu.vector_store %arg8[%c0_32, %c0_33, %c0_34], %198 {strides = array<i32>} : memref<1x4x256xf32, #tpu.memory_space<vmem>>, vector<1x4x256xf32>,
    return
  }
  func.func @transform_0(%arg0: i32) -> (i32, i32, i32) {
    %c0_i32 = arith.constant 0 : i32
    %c0_i32_0 = arith.constant 0 : i32
    %c0_i32_1 = arith.constant 0 : i32
    return %arg0, %c0_i32, %c0_i32_0 : i32, i32, i32
  }
  func.func @transform_1(%arg0: i32) -> (i32, i32) {
    %c0_i32 = arith.constant 0 : i32
    %c0_i32_0 = arith.constant 0 : i32
    %c0_i32_1 = arith.constant 0 : i32
    return %c0_i32, %c0_i32_0 : i32, i32
  }
  func.func @transform_2(%arg0: i32) -> (i32, i32) {
    %c0_i32 = arith.constant 0 : i32
    %c0_i32_0 = arith.constant 0 : i32
    %c0_i32_1 = arith.constant 0 : i32
    return %c0_i32, %c0_i32_0 : i32, i32
  }
  func.func @transform_3(%arg0: i32) -> (i32, i32) {
    %c0_i32 = arith.constant 0 : i32
    %c0_i32_0 = arith.constant 0 : i32
    %c0_i32_1 = arith.constant 0 : i32
    return %c0_i32, %c0_i32_0 : i32, i32
  }
  func.func @transform_4(%arg0: i32) -> (i32, i32) {
    %c0_i32 = arith.constant 0 : i32
    %c0_i32_0 = arith.constant 0 : i32
    %c0_i32_1 = arith.constant 0 : i32
    return %c0_i32, %c0_i32_0 : i32, i32
  }
  func.func @transform_5(%arg0: i32) -> (i32, i32) {
    %c0_i32 = arith.constant 0 : i32
    %c0_i32_0 = arith.constant 0 : i32
    %c0_i32_1 = arith.constant 0 : i32
    return %c0_i32, %c0_i32_0 : i32, i32
  }
  func.func @transform_6(%arg0: i32) -> (i32, i32) {
    %c0_i32 = arith.constant 0 : i32
    %c0_i32_0 = arith.constant 0 : i32
    %c0_i32_1 = arith.constant 0 : i32
    return %c0_i32, %c0_i32_0 : i32, i32
  }
  func.func @transform_7(%arg0: i32) -> (i32, i32, i32) {
    %c0_i32 = arith.constant 0 : i32
    %c0_i32_0 = arith.constant 0 : i32
    %c0_i32_1 = arith.constant 0 : i32
    return %arg0, %c0_i32, %c0_i32_0 : i32, i32, i32
  }
}

</mosaic_0001>

<bundles_post_ra>
// kernel: tpu_custom_call.1
= control target key start
LH: loop header
LB: loop body
LE: loop exit
PB: predicated region body
PF: predicated region fallthrough
CT: control target
= control target key end

     0   :  { %12 = vsyncpa [#allocation3], 0  ;;  %s1317_s0 = inlined_call_operand.vmem [shape: f32[2,4,256], index: 0, kind: input, shape index: {}]   ;;  %s1318_s1 = inlined_call_operand.vmem [shape: f32[8,4], index: 1, kind: input, shape index: {}]   ;;  %s1319_s2 = inlined_call_operand.vmem [shape: f32[8,1], index: 2, kind: input, shape index: {}]   ;;  %s1320_s3 = inlined_call_operand.vmem [shape: f32[8,9], index: 3, kind: input, shape index: {}]   ;;  %s1321_s4 = inlined_call_operand.vmem [shape: f32[8,1], index: 4, kind: input, shape index: {}]   ;;  %s1322_s5 = inlined_call_operand.vmem [shape: f32[4,8], index: 5, kind: input, shape index: {}]   ;;  %s1323_s6 = inlined_call_operand.vmem [shape: f32[4,1], index: 6, kind: input, shape index: {}]   ;;  %s1324_s7 = inlined_call_operand.hbm [shape: f32[2,4,256], index: 7, kind: output, shape index: {}]  }
   0x1   :  { %14 = vsyncpa [#allocation3 + $0x1], 0  ;;  %s1089_s24 = smov 0   ;;  %s1091_s25 = smov 0  }
   0x2   :  { %s1093_s26 = smov 0   ;;  %s1095_s27 = smov 0  }
   0x3 LB: > { %s1110_s28 = sadd.s32 4294967295, %s1029_s27   ;;  %s853_s29 = sadd.s32 4294967294, %s1029_s27   ;;  %s1029_s27 = sphi %s1095_s27, %s1338_s27   ;;  %s1025_s26 = sphi %s1093_s26, %s1337_s26   ;;  %s1021_s25 = sphi %s1091_s25, %s1336_s25   ;;  %s1017_s24 = sphi %s1089_s24, %s1335_s24  }
   0x4   : > { %s1114_s30 = sadd.s32 1, %s1029_s27   ;;  %s179_s8 = sadd.s32 1, %s1025_s26 }
   0x5   : > { %s176_s9 = ssub.s32 %s1029_s27, %s1114_s30  ;;  %p189_p0 = scmp.ne.s32.totalorder %s1025_s26, %s1021_s25 }
   0x6   : > { %p177_p1 = scmp.eq.s32.totalorder %s176_s9, 0  ;;  %p190_p2 = scmp.eq.s32.totalorder %s1110_s28, 1 }
   0x7   : > { %p195_p3 = scmp.ne.s32.totalorder %s1021_s25, %s1017_s24  ;;  %p196_p4 = scmp.eq.s32.totalorder %s853_s29, 1 }
   0x8   : > { %s1125_s10 = scalar_select %p177_p1, %s1025_s26, %s179_s8  }
   0x9   : > { %p1127_p5 = por %p190_p2, %p189_p0  ;;  %p1131_p6 = por %p196_p4, %p195_p3 }
   0xa   : > { %p856_p7 = scmp.ge.s32.totalorder %s1029_s27, 1  ;;  %p240_p8 = scmp.lt.s32.totalorder %s1029_s27, 3 }
   0xc   : > { %p241_p9 = pnand %p856_p7, %p240_p8 }
   0xd   : > { %p272_p10 = scmp.lt.s32.totalorder (!%p241_p9), %s1110_s28, 1  ;;  %s1039_s29 = smov (!%p241_p9), 17  }
   0xe   : > { %244 = sbr.rel (%p241_p9) target bundleno = 542 (0x21e), region = 48  ;;  %s1040_s8 = smov (!%p241_p9), 126  }
   0xf   : > { %s1041_s9 = smov (!%p241_p9), 112   ;;  %s1042_s13 = smov (!%p241_p9), 110  }
  0x10   : > { %s1043_s14 = smov (!%p241_p9), 94   ;;  %s1044_s15 = smov (!%p241_p9), 96  }
  0x11   : > { %s1045_s16 = smov (!%p241_p9), 127   ;;  %s1047_s17 = smov (!%p241_p9), 111  }
  0x12   : > { %s1048_s18 = smov (!%p241_p9), 95  }
  0x13   : > { %v277_v0 = vld [vmem:[%s1318_s1] sm:$0xff]  ;;  %v1031_v1 = vmov 0   ;;  %v1032_v2 = vmov 2   ;;  %v1033_v5 = vmov 1   ;;  %v1034_v6 = vmov 3   ;;  %s273_s19 = scalar_select %p272_p10, %s1110_s28, 1 }
  0x14   : > { %928 = vset.pattern.permute.xlu0 %v1031_v1  ;;  %930 = vset.pattern.permute.xlu1 %v1032_v2  ;;  %v278_v3 = vld [vmem:[%s1319_s2] sm:$0xff]  ;;  %v1035_v8 = vmov 4   ;;  %v1036_v9 = vmov 5   ;;  %v1037_v10 = vmov 7   ;;  %v1038_v13 = vmov 6  }
  0x15   : > { %282 = vperm.xlu0 %928, %v277_v0   ;;  %311 = vperm.xlu1 %930, %v277_v0   ;;  %v1149_v4 = vld [vmem:[%s1320_s3] sm:$0xff]  ;;  %s869_s20 = sshll.u32 %s273_s19, 3  ;;  %vm391_vm8 = vcmask 138240   ;;  %vm480_vm10 = vcmask 1031168   ;;  %vm461_vm12 = vcmask 1039360   ;;  %vm501_vm15 = vcmask 916480  }
  0x16   : > { %932 = vset.pattern.permute.xlu2 %v1031_v1  ;;  %s276_s23 = scalar_lea.vmem %s1317_s0, %s869_s20 }
  0x17   : > { %340 = vperm.xlu2 %932, %v278_v3   ;;  %v279_v7 = vld [vmem:[%s276_s23] sm:$0xff] }
  0x18   : > { %763 = vst [vmem:[#allocation1] ss:$2 sm:$0xff] %v279_v7  ;;  %v286_v14 = vperm.slane %v279_v7, 0  ;;  %v287_v15 = vperm.slane %v279_v7, 4  ;;  %v300_v16 = vperm.slane %v279_v7, 1  ;;  %v301_v17 = vperm.slane %v279_v7, 5 }
  0x19   : > { %v314_v18 = vperm.slane %v279_v7, 2  ;;  %v315_v19 = vperm.slane %v279_v7, 6  ;;  %v328_v20 = vperm.slane %v279_v7, 3  ;;  %v329_v21 = vperm.slane %v279_v7, 7 }
  0x1a   : > { %v290_v22 = vperm.slane %v286_v14, 0  ;;  %v291_v23 = vperm.slane %v287_v15, 0  ;;  %v304_v24 = vperm.slane %v300_v16, 1  ;;  %v305_v25 = vperm.slane %v301_v17, 1 }
  0x1b   : > { %v318_v26 = vperm.slane %v314_v18, 2  ;;  %v319_v27 = vperm.slane %v315_v19, 2  ;;  %v332_v28 = vperm.slane %v328_v20, 3  ;;  %v333_v29 = vperm.slane %v329_v21, 3 }
  0x1d   : > { %929 = vset.pattern.permute.xlu0 %v1033_v5  ;;  %931 = vset.pattern.permute.xlu1 %v1034_v6 }
  0x1e   : > { %297 = vperm.xlu0 %929, %v277_v0   ;;  %325 = vperm.xlu1 %931, %v277_v0  }
  0x1f   : > { %438 = vperm.xlu2 %932, %v1149_v4  }
  0x26   : > { %933 = vset.pattern.permute.xlu1 %v1032_v2  ;;  %934 = vset.pattern.permute.xlu0 %v1035_v8 }
  0x27   : > { %488 = vperm.xlu1 %933, %v1149_v4   ;;  %936 = vset.pattern.permute.xlu2 %v1034_v6 }
  0x28   : > { %509 = vperm.xlu2 %936, %v1149_v4   ;;  %517 = vperm.xlu0 %934, %v1149_v4  }
  0x2f   : > { %935 = vset.pattern.permute.xlu1 %v1037_v10 }
  0x30   : > { %937 = vset.pattern.permute.xlu0 %v1036_v9  ;;  %582 = vperm.xlu1 %935, %v1149_v4  }
  0x31   : > { %553 = vperm.xlu0 %937, %v1149_v4   ;;  %939 = vset.pattern.permute.xlu2 %v1038_v13 }
  0x32   : > { %574 = vperm.xlu2 %939, %v1149_v4  }
  0x38   : > { %941 = vset.pattern.permute.xlu1 %v1031_v1 }
  0x39   : > { %938 = vset.pattern.permute.xlu0 %v1033_v5 }
  0x3a   : > { %446 = vperm.xlu0 %938, %v1149_v4  }
  0x71   : > { %v341_v46 = vpop.permute.xlu2 %340 }
  0x79   : > { %v1172_v21 = vpop.permute.xlu2 %438 }
  0x87   : > { %v283_v11 = vpop.permute.xlu0 %282  ;;  %v312_v12 = vpop.permute.xlu1 %311 }
  0x88   : > { %v292_v32 = vmul.f32 %v290_v22, %v283_v11  ;;  %v293_v33 = vmul.f32 %v291_v23, %v283_v11  ;;  %v320_v36 = vmul.f32 %v318_v26, %v312_v12  ;;  %v321_v37 = vmul.f32 %v319_v27, %v312_v12  ;;  %v1174_v22 = vpop.permute.xlu2 %509 }
  0x90   : > { %v298_v30 = vpop.permute.xlu0 %297  ;;  %v326_v31 = vpop.permute.xlu1 %325 }
  0x91   : > { %v306_v34 = vmul.f32 %v304_v24, %v298_v30  ;;  %v307_v35 = vmul.f32 %v305_v25, %v298_v30  ;;  %v334_v40 = vmul.f32 %v332_v28, %v326_v31  ;;  %v335_v41 = vmul.f32 %v333_v29, %v326_v31  ;;  %v1176_v23 = vpop.permute.xlu2 %574 }
  0x93   : > { %v308_v38 = vadd.f32 %v306_v34, %v292_v32  ;;  %v309_v39 = vadd.f32 %v307_v35, %v293_v33  ;;  %v1046_v35 = vmov 8  }
  0x94   : > { %940 = vset.pattern.permute.xlu2 %v1046_v35 }
  0x95   : > { %v322_v42 = vadd.f32 %v320_v36, %v308_v38  ;;  %v323_v43 = vadd.f32 %v321_v37, %v309_v39 }
  0x97   : > { %v336_v44 = vadd.f32 %v334_v40, %v322_v42  ;;  %v337_v45 = vadd.f32 %v335_v41, %v323_v43  ;;  %v673_v43 = vld [vmem:[%s1322_s5] sm:$0xf] }
  0x99   : > { %v343_v47 = vadd.f32 %v341_v46, %v336_v44  ;;  %v344_v48 = vadd.f32 %v341_v46, %v337_v45  ;;  %v1181_v26 = vpop.permute.xlu1 %488  ;;  %v625_v45 = vld [vmem:[%s1321_s4] sm:$0xff] }
  0x9a   : > { %v518_v31 = vpop.permute.xlu0 %517  ;;  %v755_v46 = vld [vmem:[%s1323_s6] sm:$0xf] }
  0x9b   : > { %v860_v49 = vmul.f32 -1.442695, %v343_v47  ;;  %v861_v50 = vmul.f32 -1.442695, %v344_v48 }
  0x9d   : > { %951 = vpow2.f32 %v860_v49 }
  0x9e   : > { %953 = vpow2.f32 %v861_v50 }
  0xa2   : > { %v583_v27 = vpop.permute.xlu1 %582 }
  0xa3   : > { %v952_v51 = vpop.eup %951  ;;  %v1189_v32 = vpop.permute.xlu0 %553 }
  0xa4   : > { %v954_v52 = vpop.eup %953  ;;  %v351_v53 = vadd.f32 1.0, %v952_v51 }
  0xa5   : > { %v352_v54 = vadd.f32 1.0, %v954_v52 }
  0xa6   : > { %955 = vrcp.f32 %v351_v53  ;;  %v364_v61 = vand.u32 2147483648, %v351_v53  ;;  %v362_v0 = vand.u32 2147483647, %v351_v53  ;;  %vm358_vm2 = vweird.f32 %v351_v53 }
  0xa7   : > { %957 = vrcp.f32 %v352_v54  ;;  %v379_v62 = vand.u32 2147483648, %v352_v54  ;;  %v377_v5 = vand.u32 2147483647, %v352_v54  ;;  %vm373_vm3 = vweird.f32 %v352_v54 }
  0xa8   : > { %v365_v12 = vor.u32 1.1754944e-38, %v364_v61  ;;  %vm363_vm6 = vcmp.eq.f32.partialorder %v362_v0, 8.507059e+37 }
  0xa9   : > { %v380_v14 = vor.u32 1.1754944e-38, %v379_v62  ;;  %vm378_vm7 = vcmp.eq.f32.partialorder %v377_v5, 8.507059e+37 }
  0xac   : > { %v956_v55 = vpop.eup %955  ;;  %v447_v33 = vpop.permute.xlu0 %446 }
  0xad   : > { %v958_v56 = vpop.eup %957  ;;  %v354_v57 = vmul.f32 %v956_v55, %v351_v53  ;;  %vm359_vm0 = vweird.f32 %v956_v55 }
  0xae   : > { %v369_v58 = vmul.f32 %v958_v56, %v352_v54  ;;  %vm374_vm1 = vweird.f32 %v958_v56  ;;  %vm360_vm4 = vmor %vm358_vm2, %vm359_vm0  ;;  %vm545_vm0 = vcmask 900096   ;;  %vm532_vm2 = vcmask 908288  }
  0xaf   : > { %v355_v59 = vsub.f32 1.0, %v354_v57  ;;  %vm375_vm5 = vmor %vm373_vm3, %vm374_vm1  ;;  %vm566_vm1 = vcmask 785408   ;;  %vm610_vm3 = vcmask 769024  }
  0xb0   : > { %v370_v60 = vsub.f32 1.0, %v369_v58 }
  0xb1   : > { %v356_v63 = vmul.f32 %v956_v55, %v355_v59 }
  0xb2   : > { %v371_v3 = vmul.f32 %v958_v56, %v370_v60 }
  0xb3   : > { %v357_v7 = vadd.f32 %v956_v55, %v356_v63 }
  0xb4   : > { %v372_v11 = vadd.f32 %v958_v56, %v371_v3 }
  0xb5   : > { %v361_v15 = vsel %vm360_vm4, %v956_v55, %v357_v7  ;;  %vm597_vm4 = vcmask 777216  }
  0xb6   : > { %v376_v16 = vsel %vm375_vm5, %v958_v56, %v372_v11  ;;  %v366_v17 = vsel %vm363_vm6, %v365_v12, %v361_v15 }
  0xb7   : > { %v381_v18 = vsel %vm378_vm7, %v380_v14, %v376_v16  ;;  %v383_v19 = vmul.f32 %v366_v17, %v343_v47 }
  0xb8   : > { %v384_v20 = vmul.f32 %v381_v18, %v344_v48 }
  0xb9   : > { %387 = vrot.lane.b32.xlu2 %v383_v19, %s1039_s29 }
  0xba   : > { %389 = vrot.lane.b32.xlu1 %v384_v20, %s1039_s29  ;;  %s987_s29 = scalar_lea.hbm %s1324_s7, 16 }
 0x113   : > { %v388_v24 = vpop.permute.xlu2 %387 }
 0x114   : > { %v1178_v25 = vsel %vm391_vm8, 0.0, %v388_v24 }
 0x115   : > { %474 = vrot.lane.b32.xlu1 %v1178_v25, %s1040_s8  ;;  %v520_v36 = vmul.f32 %v518_v31, %v1178_v25  ;;  %v449_v37 = vmul.f32 %v447_v33, %v1178_v25  ;;  %v585_v40 = vmul.f32 %v583_v27, %v1178_v25 }
 0x12c   : > { %v390_v28 = vpop.permute.xlu1 %389 }
 0x12d   : > { %v1183_v29 = vsel %vm391_vm8, %v388_v24, %v390_v28  ;;  %v397_v30 = vsel %vm391_vm8, %v390_v28, 0.0 }
 0x12e   : > { %478 = vrot.lane.b32.xlu0 %v397_v30, %s1040_s8  ;;  %499 = vrot.lane.b32.xlu1 %v397_v30, %s1041_s9  ;;  %v451_v34 = vmul.f32 %v447_v33, %v397_v30  ;;  %v587_v38 = vmul.f32 %v583_v27, %v397_v30  ;;  %v450_v39 = vmul.f32 %v447_v33, %v1183_v29 }
 0x12f   : > { %476 = vrot.lane.b32.xlu2 %v1183_v29, %s1040_s8  ;;  %v521_v41 = vmul.f32 %v518_v31, %v1183_v29  ;;  %v522_v42 = vmul.f32 %v518_v31, %v397_v30  ;;  %v586_v44 = vmul.f32 %v583_v27, %v1183_v29  ;;  %s269_s8 = sand.u32 1, %s1021_s25  }
 0x136   : > { %539 = vrot.lane.b32.xlu0 %v1178_v25, %s1042_s13  ;;  %541 = vrot.lane.b32.xlu1 %v1183_v29, %s1042_s13 }
 0x137   : > { %495 = vrot.lane.b32.xlu2 %v1178_v25, %s1041_s9 }
 0x13e   : > { %606 = vrot.lane.b32.xlu0 %v1183_v29, %s1043_s14  ;;  %562 = vrot.lane.b32.xlu1 %v1183_v29, %s1044_s15 }
 0x13f   : > { %497 = vrot.lane.b32.xlu2 %v1183_v29, %s1041_s9  ;;  %s857_s9 = sshll.u32 %s269_s8, 3 }
 0x146   : > { %459 = vrot.lane.b32.xlu0 %v451_v34, %s1045_s16  ;;  %560 = vrot.lane.b32.xlu1 %v1178_v25, %s1044_s15 }
 0x147   : > { %543 = vrot.lane.b32.xlu2 %v397_v30, %s1042_s13  ;;  %s870_s13 = sshll.u32 %s1110_s28, 3  ;;  %s778_s28 = scalar_lea.sflag [#allocation3], %s269_s8 }
 0x14e   : > { %526 = vrot.lane.b32.xlu0 %v520_v36, %s1047_s17  ;;  %608 = vrot.lane.b32.xlu1 %v397_v30, %s1043_s14 }
 0x14f   : > { %564 = vrot.lane.b32.xlu2 %v397_v30, %s1044_s15 }
 0x156   : > { %595 = vrot.lane.b32.xlu0 %v587_v38, %s1048_s18  ;;  %455 = vrot.lane.b32.xlu1 %v449_v37, %s1045_s16 }
 0x157   : > { %457 = vrot.lane.b32.xlu2 %v450_v39, %s1045_s16  ;;  %s789_s16 = scalar_lea.hbm %s1324_s7, %s870_s13 }
 0x158   : > { %s793_s19 = sshll.u32 %s789_s16, 4  ;;  %s794_s19 = int_to_ptr.hbm [resolvable:$true] %s793_s19 }
 0x159   : > { %s981_s20 = sshra.s32 %s794_s19, 4  ;;  %s982_s20 = int_to_ptr.hbm [resolvable:$true] %s981_s20 }
 0x15a   : > { %s983_s21 = scalar_lea.hbm %s982_s20, 8  ;;  %p988_p0 = scmp.lt.s32.totalorder %s982_s20, %s1324_s7 }
 0x15b   : > { %p984_p11 = scmp.ne.s32.totalorder %s982_s20, %s983_s21  ;;  %p989_p1 = scmp.lt.s32.totalorder %s987_s29, %s983_s21 }
 0x15d   : > { %p985_p12 = pnand %p984_p11, %p1127_p5  ;;  %p990_p2 = por %p989_p1, %p988_p0 }
 0x15e   : > { %591 = vrot.lane.b32.xlu0 %v585_v40, %s1048_s18  ;;  %528 = vrot.lane.b32.xlu1 %v521_v41, %s1047_s17 }
 0x15f   : > { %530 = vrot.lane.b32.xlu2 %v522_v42, %s1047_s17  ;;  %s271_s17 = scalar_lea.vmem [#allocation2], %s857_s9  ;;  %p986_p13 = pneg %p985_p12 }
 0x161   : > { %p991_p3 = pnand %p990_p2, %p986_p13 }
 0x166   : > { %686 = vperm.xlu0 %938, %v673_v43   ;;  %604 = vrot.lane.b32.xlu1 %v1178_v25, %s1043_s14 }
 0x167   : > { %593 = vrot.lane.b32.xlu2 %v586_v44, %s1048_s18  ;;  %s791_s18 = sshll.u32 %s271_s17, 4  ;;  %s792_s18 = int_to_ptr.vmem [resolvable:$true] %s791_s18 }
 0x16e   : > { %628 = vperm.xlu1 %941, %v625_v45   ;;  %947 = vset.pattern.permute.xlu0 %v1038_v13 }
 0x16f   : > { %618 = vperm.xlu2 %940, %v1149_v4   ;;  %736 = vperm.xlu0 %947, %v673_v43  }
 0x176   : > { %943 = vset.pattern.permute.xlu1 %v1032_v2 }
 0x177   : > { %696 = vperm.xlu1 %943, %v673_v43   ;;  %942 = vset.pattern.permute.xlu2 %v1031_v1 }
 0x178   : > { %676 = vperm.xlu2 %942, %v673_v43   ;;  %950 = vset.pattern.permute.xlu0 %v1031_v1 }
 0x17f   : > { %945 = vset.pattern.permute.xlu1 %v1035_v8 }
 0x180   : > { %716 = vperm.xlu1 %945, %v673_v43   ;;  %944 = vset.pattern.permute.xlu2 %v1034_v6 }
 0x181   : > { %706 = vperm.xlu2 %944, %v673_v43  }
 0x187   : > { %v475_v4 = vpop.permute.xlu1 %474 }
 0x188   : > { %948 = vset.pattern.permute.xlu1 %v1037_v10 }
 0x189   : > { %v477_v13 = vpop.permute.xlu2 %476  ;;  %746 = vperm.xlu1 %948, %v673_v43   ;;  %946 = vset.pattern.permute.xlu2 %v1036_v9  ;;  %v399_v9 = vlaneseq }
 0x18a   : > { %726 = vperm.xlu2 %946, %v673_v43   ;;  %v481_v0 = vsel %vm480_vm10, %v475_v4, %v477_v13 }
 0x18b   : > { %v400_v53 = vand.u32 127, %v399_v9 }
 0x18d   : > { %v406_v58 = vand.u32 15, %v400_v53 }
 0x18f   : > { %vm1232_vm11 = vcmp.ge.s32.totalorder %v406_v58, 1  ;;  %vm1239_vm13 = vcmp.lt.s32.totalorder %v406_v58, 15 }
 0x190   : > { %v434_v12 = vsel %vm1232_vm11, %v1178_v25, 0.0  ;;  %v485_v16 = vsel %vm1239_vm13, %v481_v0, 0.0 }
 0x191   : > { %v496_v2 = vpop.permute.xlu2 %495  ;;  %v441_v24 = vmul.f32 %v1172_v21, %v434_v12  ;;  %v491_v25 = vmul.f32 %v1181_v26, %v485_v16 }
 0x192   : > { %949 = vset.pattern.permute.xlu2 %v1031_v1  ;;  %v401_v1 = vadd.s32 128, %v400_v53 }
 0x193   : > { %758 = vperm.xlu2 %949, %v755_v46  }
 0x194   : > { %v413_v56 = vand.u32 15, %v401_v1 }
 0x196   : > { %vm1226_vm9 = vcmp.ge.s32.totalorder %v413_v56, 1  ;;  %vm1243_vm14 = vcmp.lt.s32.totalorder %v413_v56, 15 }
 0x197   : > { %v435_v62 = vsel %vm1226_vm9, %v1183_v29, 0.0 }
 0x198   : > { %v442_v14 = vmul.f32 %v1172_v21, %v435_v62 }
 0x199   : > { %v498_v8 = vpop.permute.xlu2 %497 }
 0x19a   : > { %v502_v18 = vsel %vm501_vm15, %v496_v2, %v498_v8 }
 0x19b   : > { %v506_v31 = vsel %vm1232_vm11, %v502_v18, 0.0 }
 0x19c   : > { %v512_v37 = vmul.f32 %v1174_v22, %v506_v31 }
 0x1a0   : > { %v479_v47 = vpop.permute.xlu0 %478  ;;  %v500_v6 = vpop.permute.xlu1 %499 }
 0x1a1   : > { %v544_v48 = vpop.permute.xlu2 %543  ;;  %v482_v5 = vsel %vm480_vm10, %v477_v13, %v479_v47  ;;  %v503_v19 = vsel %vm501_vm15, %v498_v8, %v500_v6 }
 0x1a2   : > { %v486_v17 = vsel %vm1243_vm14, %v482_v5, 0.0  ;;  %v507_v33 = vsel %vm1226_vm9, %v503_v19, 0.0 }
 0x1a3   : > { %v492_v29 = vmul.f32 %v1181_v26, %v486_v17  ;;  %v513_v38 = vmul.f32 %v1174_v22, %v507_v33 }
 0x1a8   : > { %v540_v49 = vpop.permute.xlu0 %539  ;;  %v542_v10 = vpop.permute.xlu1 %541 }
 0x1a9   : > { %v565_v52 = vpop.permute.xlu2 %564  ;;  %v547_v34 = vsel %vm545_vm0, %v542_v10, %v544_v48  ;;  %v546_v21 = vsel %vm545_vm0, %v540_v49, %v542_v10 }
 0x1aa   : > { %v551_v26 = vsel %vm1243_vm14, %v547_v34, 0.0  ;;  %v550_v41 = vsel %vm1239_vm13, %v546_v21, 0.0 }
 0x1ab   : > { %v557_v46 = vmul.f32 %v1189_v32, %v551_v26  ;;  %v556_v6 = vmul.f32 %v1189_v32, %v550_v41 }
 0x1b0   : > { %v563_v50 = vpop.permute.xlu1 %562  ;;  %v1224_v51 = vpop.permute.xlu0 %606 }
 0x1b1   : > { %v458_v57 = vpop.permute.xlu2 %457  ;;  %v568_v39 = vsel %vm566_vm1, %v563_v50, %v565_v52 }
 0x1b2   : > { %v572_v22 = vsel %vm1226_vm9, %v568_v39, 0.0 }
 0x1b3   : > { %v578_v10 = vmul.f32 %v1176_v23, %v572_v22 }
 0x1b8   : > { %v561_v54 = vpop.permute.xlu1 %560  ;;  %v460_v55 = vpop.permute.xlu0 %459 }
 0x1b9   : > { %v463_v7 = vsel %vm461_vm12, %v458_v57, %v460_v55  ;;  %v531_v15 = vpop.permute.xlu2 %530  ;;  %v567_v13 = vsel %vm566_vm1, %v561_v54, %v563_v50 }
 0x1ba   : > { %v467_v20 = vadd.f32 %v463_v7, %v442_v14  ;;  %v571_v48 = vsel %vm1232_vm11, %v567_v13, 0.0 }
 0x1bb   : > { %v577_v50 = vmul.f32 %v1176_v23, %v571_v48 }
 0x1bc   : > { %v494_v35 = vadd.f32 %v492_v29, %v467_v20 }
 0x1be   : > { %v515_v45 = vadd.f32 %v513_v38, %v494_v35 }
 0x1c0   : > { %v1230_v60 = vpop.permute.xlu1 %608  ;;  %v527_v11 = vpop.permute.xlu0 %526 }
 0x1c1   : > { %v594_v42 = vpop.permute.xlu2 %593  ;;  %v612_v1 = vsel %vm610_vm3, %v1224_v51, %v1230_v60 }
 0x1c2   : > { %v616_v23 = vsel %vm1243_vm14, %v612_v1, 0.0 }
 0x1c8   : > { %v456_v27 = vpop.permute.xlu1 %455  ;;  %v596_v40 = vpop.permute.xlu0 %595 }
 0x1c9   : > { %v462_v28 = vsel %vm461_vm12, %v456_v27, %v458_v57  ;;  %v599_v56 = vsel %vm597_vm4, %v594_v42, %v596_v40  ;;  %v619_v57 = vpop.permute.xlu2 %618 }
 0x1ca   : > { %v466_v30 = vadd.f32 %v462_v28, %v441_v24  ;;  %v622_v0 = vmul.f32 %v619_v57, %v616_v23 }
 0x1cc   : > { %v493_v36 = vadd.f32 %v491_v25, %v466_v30 }
 0x1ce   : > { %v514_v44 = vadd.f32 %v512_v37, %v493_v36 }
 0x1d0   : > { %v529_v43 = vpop.permute.xlu1 %528  ;;  %v592_v54 = vpop.permute.xlu0 %591 }
 0x1d1   : > { %v533_v2 = vsel %vm532_vm2, %v527_v11, %v529_v43  ;;  %v534_v4 = vsel %vm532_vm2, %v529_v43, %v531_v15  ;;  %v598_v62 = vsel %vm597_vm4, %v592_v54, %v594_v42 }
 0x1d2   : > { %v537_v8 = vadd.f32 %v533_v2, %v514_v44  ;;  %v538_v47 = vadd.f32 %v534_v4, %v515_v45  ;;  %v677_v19 = vpop.permute.xlu2 %676 }
 0x1d4   : > { %v559_v49 = vadd.f32 %v557_v46, %v538_v47  ;;  %v558_v9 = vadd.f32 %v556_v6, %v537_v8 }
 0x1d6   : > { %v580_v52 = vadd.f32 %v578_v10, %v559_v49  ;;  %v579_v55 = vadd.f32 %v577_v50, %v558_v9 }
 0x1d8   : > { %v605_v53 = vpop.permute.xlu1 %604  ;;  %v603_v61 = vadd.f32 %v599_v56, %v580_v52  ;;  %v602_v5 = vadd.f32 %v598_v62, %v579_v55  ;;  %v687_v46 = vpop.permute.xlu0 %686 }
 0x1d9   : > { %v611_v32 = vsel %vm610_vm3, %v605_v53, %v1224_v51 }
 0x1da   : > { %v615_v58 = vsel %vm1239_vm13, %v611_v32, 0.0  ;;  %v624_v11 = vadd.f32 %v622_v0, %v603_v61  ;;  %vm773_vm13 = vcmask 1043456  }
 0x1db   : > { %v621_v59 = vmul.f32 %v619_v57, %v615_v58  ;;  %v707_v42 = vpop.permute.xlu2 %706 }
 0x1dd   : > { %v623_v7 = vadd.f32 %v621_v59, %v602_v5 }
 0x1e0   : > { %v629_v60 = vpop.permute.xlu1 %628 }
 0x1e1   : > { %v631_v12 = vadd.f32 %v629_v60, %v623_v7  ;;  %v632_v14 = vadd.f32 %v629_v60, %v624_v11 }
 0x1e3   : > { %v862_v15 = vmul.f32 -1.442695, %v631_v12  ;;  %v863_v51 = vmul.f32 -1.442695, %v632_v14 }
 0x1e4   : > { %v727_v62 = vpop.permute.xlu2 %726 }
 0x1e5   : > { %959 = vpow2.f32 %v862_v15 }
 0x1e6   : > { %961 = vpow2.f32 %v863_v51 }
 0x1e9   : > { %v697_v30 = vpop.permute.xlu1 %696 }
 0x1eb   : > { %v960_v16 = vpop.eup %959 }
 0x1ec   : > { %v962_v63 = vpop.eup %961  ;;  %v639_v17 = vadd.f32 1.0, %v960_v16 }
 0x1ed   : > { %v640_v18 = vadd.f32 1.0, %v962_v63 }
 0x1ee   : > { %963 = vrcp.f32 %v639_v17  ;;  %v652_v25 = vand.u32 2147483648, %v639_v17  ;;  %v650_v33 = vand.u32 2147483647, %v639_v17  ;;  %vm646_vm7 = vweird.f32 %v639_v17 }
 0x1ef   : > { %965 = vrcp.f32 %v640_v18  ;;  %v667_v34 = vand.u32 2147483648, %v640_v18  ;;  %v665_v36 = vand.u32 2147483647, %v640_v18  ;;  %vm661_vm9 = vweird.f32 %v640_v18 }
 0x1f0   : > { %v653_v37 = vor.u32 1.1754944e-38, %v652_v25  ;;  %vm651_vm10 = vcmp.eq.f32.partialorder %v650_v33, 8.507059e+37 }
 0x1f1   : > { %v668_v39 = vor.u32 1.1754944e-38, %v667_v34  ;;  %vm666_vm12 = vcmp.eq.f32.partialorder %v665_v36, 8.507059e+37  ;;  %v759_v34 = vpop.permute.xlu2 %758  ;;  %v765_v36 = vld.sshfl [vmem:[#allocation1 + $0x8] sm:$0xff pattern:$0x75316420] }
 0x1f2   : > { %v717_v6 = vpop.permute.xlu1 %716 }
 0x1f4   : > { %v964_v3 = vpop.eup %963 }
 0x1f5   : > { %v966_v20 = vpop.eup %965  ;;  %v642_v24 = vmul.f32 %v964_v3, %v639_v17  ;;  %vm647_vm5 = vweird.f32 %v964_v3 }
 0x1f6   : > { %v657_v27 = vmul.f32 %v966_v20, %v640_v18  ;;  %vm662_vm6 = vweird.f32 %v966_v20  ;;  %vm648_vm8 = vmor %vm646_vm7, %vm647_vm5 }
 0x1f7   : > { %v643_v28 = vsub.f32 1.0, %v642_v24  ;;  %vm663_vm11 = vmor %vm661_vm9, %vm662_vm6 }
 0x1f8   : > { %v658_v29 = vsub.f32 1.0, %v657_v27 }
 0x1f9   : > { %v644_v31 = vmul.f32 %v964_v3, %v643_v28 }
 0x1fa   : > { %v659_v35 = vmul.f32 %v966_v20, %v658_v29 }
 0x1fb   : > { %v645_v21 = vadd.f32 %v964_v3, %v644_v31  ;;  %v747_v17 = vpop.permute.xlu1 %746 }
 0x1fc   : > { %v660_v38 = vadd.f32 %v966_v20, %v659_v35 }
 0x1fd   : > { %v649_v26 = vsel %vm648_vm8, %v964_v3, %v645_v21 }
 0x1fe   : > { %v654_v40 = vsel %vm651_vm10, %v653_v37, %v649_v26  ;;  %v664_v41 = vsel %vm663_vm11, %v966_v20, %v660_v38  ;;  %v764_v38 = vld.sshfl [vmem:[#allocation1] sm:$0xff pattern:$0x75316420] }
 0x1ff   : > { %v669_v43 = vsel %vm666_vm12, %v668_v39, %v664_v41  ;;  %v671_v44 = vmul.f32 %v654_v40, %v631_v12 }
 0x200   : > { %v672_v45 = vmul.f32 %v669_v43, %v632_v14  ;;  %v737_v14 = vpop.permute.xlu0 %736 }
 0x201   : > { %v699_v13 = vperm.slane %v671_v44, 2  ;;  %v679_v2 = vperm.slane %v671_v44, 0  ;;  %v689_v4 = vperm.slane %v671_v44, 1  ;;  %v719_v50 = vperm.slane %v671_v44, 4 }
 0x202   : > { %v700_v22 = vperm.slane %v672_v45, 2  ;;  %v680_v8 = vperm.slane %v672_v45, 0  ;;  %v690_v47 = vperm.slane %v672_v45, 1  ;;  %v709_v1 = vperm.slane %v671_v44, 3 }
 0x203   : > { %v691_v48 = vmul.f32 %v689_v4, %v687_v46  ;;  %v681_v49 = vmul.f32 %v679_v2, %v677_v19  ;;  %v701_v52 = vmul.f32 %v699_v13, %v697_v30  ;;  %v710_v54 = vperm.slane %v672_v45, 3 }
 0x204   : > { %v682_v10 = vmul.f32 %v680_v8, %v677_v19  ;;  %v692_v9 = vmul.f32 %v690_v47, %v687_v46  ;;  %v702_v55 = vmul.f32 %v700_v22, %v697_v30  ;;  %v720_v56 = vperm.slane %v672_v45, 4 }
 0x205   : > { %v693_v53 = vadd.f32 %v691_v48, %v681_v49  ;;  %v711_v58 = vmul.f32 %v709_v1, %v707_v42  ;;  %v721_v59 = vmul.f32 %v719_v50, %v717_v6  ;;  %v712_v23 = vmul.f32 %v710_v54, %v707_v42 }
 0x206   : > { %v694_v32 = vadd.f32 %v692_v9, %v682_v10  ;;  %v739_v5 = vperm.slane %v671_v44, 6  ;;  %v729_v7 = vperm.slane %v671_v44, 5  ;;  %v730_v11 = vperm.slane %v672_v45, 5 }
 0x207   : > { %v703_v57 = vadd.f32 %v701_v52, %v693_v53  ;;  %v722_v60 = vmul.f32 %v720_v56, %v717_v6  ;;  %v740_v15 = vperm.slane %v672_v45, 6  ;;  %v749_v51 = vperm.slane %v671_v44, 7 }
 0x208   : > { %v704_v61 = vadd.f32 %v702_v55, %v694_v32  ;;  %v731_v63 = vmul.f32 %v729_v7, %v727_v62  ;;  %v750_v18 = vperm.slane %v672_v45, 7  ;;  %v732_v19 = vmul.f32 %v730_v11, %v727_v62 }
 0x209   : > { %v713_v0 = vadd.f32 %v711_v58, %v703_v57  ;;  %v741_v20 = vmul.f32 %v739_v5, %v737_v14  ;;  %v742_v27 = vmul.f32 %v740_v15, %v737_v14  ;;  %v751_v25 = vmul.f32 %v749_v51, %v747_v17 }
 0x20a   : > { %v714_v12 = vadd.f32 %v712_v23, %v704_v61  ;;  %v752_v30 = vmul.f32 %v750_v18, %v747_v17 }
 0x20b   : > { %v723_v16 = vadd.f32 %v721_v59, %v713_v0 }
 0x20c   : > { %v724_v3 = vadd.f32 %v722_v60, %v714_v12 }
 0x20d   : > { %v733_v24 = vadd.f32 %v731_v63, %v723_v16 }
 0x20e   : > { %v734_v28 = vadd.f32 %v732_v19, %v724_v3 }
 0x20f   : > { %v743_v29 = vadd.f32 %v741_v20, %v733_v24 }
 0x210   : > { %v744_v31 = vadd.f32 %v742_v27, %v734_v28 }
 0x211   : > { %v753_v33 = vadd.f32 %v751_v25, %v743_v29 }
 0x212   : > { %v754_v35 = vadd.f32 %v752_v30, %v744_v31 }
 0x213   : > { %v761_v21 = vadd.f32 %v759_v34, %v753_v33 }
 0x214   : > { %v762_v37 = vadd.f32 %v759_v34, %v754_v35 }
 0x215   : > { %v768_v39 = vadd.f32 %v764_v38, %v761_v21 }
 0x216   : > { %v769_v26 = vadd.f32 %v765_v36, %v762_v37 }
 0x218   : > { %v772_v40 = vrot.slane %v769_v26, 4 }
 0x21a   : > { %v774_v41 = vsel %vm773_vm13, %v768_v39, %v772_v40 }
 0x21b   : > { %776 = vst [vmem:[%s271_s17] sm:$0xff] %v774_v41 }
 0x21c   : > { %994 = shalt.err (!%p991_p3)
}
 0x21d   : > { %871 = dma.vmem_to_hbm [thread:$0]  (%p1127_p5), %s792_s18, 128, %s794_s19, %s778_s28  }
 0x21e PF: > { %p877_p4 = scmp.ge.s32.totalorder %s1029_s27, 2  ;;  %s805_s8 = sand.u32 1, %s1017_s24  }
 0x21f   : > { %s806_s14 = scalar_lea.sflag [#allocation3], %s805_s8 }
 0x220   : > { %p874_p7 = pnand %p877_p4, %p1131_p6 }
 0x222   : > { %p875_p8 = pneg %p874_p7 }
 0x224   : > { %1012 = dma.done.wait (%p875_p8), %s806_s14, 128  }
 0x225   : > { %1014 = vsyncadd (%p875_p8), %s806_s14, 4294967168  ;;  %p17_p9 = scmp.ge.s32.totalorder %s1114_s30, 4   ;;  %s1335_s24 = smov %s1021_s25 }
 0x226   : > { %s1336_s25 = smov %s1025_s26  ;;  %s1337_s26 = smov %s1125_s10 }
 0x227   : > { %s1338_s27 = smov %s1114_s30  ;;  %19 = sbr.rel (!%p17_p9) target bundleno = 3 (0x3), region = 83 }
 0x22c   :  { %812 = vsyncpa [#allocation3], 1 }
 0x22d   :  { %814 = vsyncpa [#allocation3 + $0x1], 1 }

</bundles_post_ra>
